<compile_context>
chip_gen: v7x
topology: tpu7x:2x2x1
jax: 0.10.0
libtpu: 0.0.40
codegen_flags: <defaults>
</compile_context>

<pallas_src>
import jax
import jax.numpy as jnp
from jax.experimental import pallas as pl
from jax.experimental.pallas import tpu as pltpu


def cosine_classifier_kernel(x_ref, w_ref, scale_ref, out_ref):
    # x_ref:     [TB, HW, C]  (VMEM)  -- channels on the lane axis
    # w_ref:     [NC, C]      (VMEM)
    # scale_ref: [1]          (SMEM scalar)
    # out_ref:   [TB, NC]     (VMEM)
    x = x_ref[...]

    # Global average pooling over spatial positions (adaptive_avg_pool2d(1) + flatten).
    # Accumulate in f32; dense sublane reduce since HW sits on the sublane axis.
    pooled = jnp.mean(x.astype(jnp.float32), axis=1)            # [TB, C]

    w = w_ref[...].astype(jnp.float32)                          # [NC, C]

    # Raw bilinear form on the MXU, contracting C directly (no transpose of w).
    raw = jax.lax.dot_general(
        pooled, w,
        dimension_numbers=(((1,), (1,)), ((), ())),
        preferred_element_type=jnp.float32)                     # [TB, NC]

    # F.normalize(·, p=2, dim=1) semantics (x / max(||x||_2, eps)), factored out of the
    # bilinear form and applied post-matmul on the tiny [TB, NC] result.
    eps = 1e-12
    f_norm = jnp.sqrt(jnp.sum(pooled * pooled, axis=1, keepdims=True))   # [TB, 1]
    w_norm = jnp.sqrt(jnp.sum(w * w, axis=1, keepdims=True))             # [NC, 1]
    inv_f = 1.0 / jnp.maximum(f_norm, eps)                               # [TB, 1]
    inv_w = 1.0 / jnp.maximum(w_norm, eps)                               # [NC, 1]

    out_ref[...] = (scale_ref[0] * raw * inv_f * inv_w.T).astype(out_ref.dtype)


def classifier_forward(x_nchw, weight, scale, *, tb=None):
    """x_nchw: [B, C, H, W]; weight: [num_classes, C]; scale: [1] float32."""
    B, C, H, W = x_nchw.shape
    NC = weight.shape[0]
    HW = H * W

    # Put channels on the lane axis: [B, HW, C]. Pure layout plumbing in the wrapper.
    x_bhwc = jnp.transpose(x_nchw, (0, 2, 3, 1)).reshape(B, HW, C)

    # Batch tile: full batch when small, otherwise 128 rows per step (multiple of 8).
    if tb is None:
        tb = B if B <= 128 else 128
    grid = (pl.cdiv(B, tb),)

    # TODO(synk): if NC ever grows, pad NC to a multiple of 128 so the output store is a
    # lane-dense unmasked vst; at NC=4 the output is full-array and masked stores are moot.
    return pl.pallas_call(
        cosine_classifier_kernel,
        out_shape=jax.ShapeDtypeStruct((B, NC), jnp.float32),
        grid=grid,
        in_specs=[
            pl.BlockSpec((tb, HW, C), lambda i: (i, 0, 0)),               # x tile
            pl.BlockSpec((NC, C), lambda i: (0, 0)),                      # full weight
            pl.BlockSpec(memory_space=pltpu.MemorySpace.SMEM),            # scale scalar
        ],
        out_specs=pl.BlockSpec((tb, NC), lambda i: (i, 0)),
        compiler_params=pltpu.CompilerParams(
            dimension_semantics=("parallel",),          # megacore-shardable batch axis
            vmem_limit_bytes=64 * 1024 * 1024,
        ),
    )(x_bhwc, weight, scale)


def reference_forward(x_nchw, weight, scale):
    # Pure-JAX reference (mirrors the PyTorch module).
    pooled = jnp.mean(x_nchw, axis=(2, 3))                                   # [B, C]
    f_hat = pooled / jnp.maximum(jnp.linalg.norm(pooled, axis=1, keepdims=True), 1e-12)
    w_hat = weight / jnp.maximum(jnp.linalg.norm(weight, axis=1, keepdims=True), 1e-12)
    return scale[0] * (f_hat @ w_hat.T)


if __name__ == "__main__":
    # Module defaults: num_channels=512, num_classes=4, cosine classifier, scale=10.0, no bias.
    B, C, H, W = 2, 512, 4, 4
    NUM_CLASSES = 4

    key = jax.random.PRNGKey(0)
    kx, kw = jax.random.split(key)

    x = jax.random.normal(kx, (B, C, H, W), dtype=jnp.float32)
    # Deterministic synthetic weight init (CosineClassifier weight [num_classes, num_channels]).
    weight = jax.random.normal(kw, (NUM_CLASSES, C), dtype=jnp.float32) * 0.02
    scale = jnp.array([10.0], dtype=jnp.float32)

    scores = classifier_forward(x, weight, scale)
    scores = jax.block_until_ready(scores)

    ref = reference_forward(x, weight, scale)
    assert scores.shape == (B, NUM_CLASSES)
    assert jnp.allclose(scores, ref, atol=1e-4, rtol=1e-4), (scores, ref)

    print("KERNEL_OK")
</pallas_src>

<mosaic_0001>
module attributes {stable_mosaic.version = 11 : i64} {
  func.func @cosine_classifier_kernel(%arg0: i32, %arg1: memref<2x16x512xf32, #tpu.memory_space<vmem>>, %arg2: memref<4x512xf32, #tpu.memory_space<vmem>>, %arg3: memref<1xf32, #tpu.memory_space<smem>>, %arg4: memref<2x4xf32, #tpu.memory_space<vmem>>) attributes {dimension_semantics = [#tpu.dimension_semantics<parallel>], iteration_bounds = array<i64: 1>, scalar_prefetch = 0 : i64, scratch_operands = 0 : i64, tpu.core_type = #tpu.core_type<tc>, window_params = [{transform_indices = @transform_0, window_bounds = array<i64: 2, 16, 512>}, {pipeline_mode = #tpu.pipeline_mode<synchronous>, transform_indices = @transform_1, window_bounds = array<i64: 4, 512>}, {transform_indices = @transform_2, window_bounds = array<i64: 1>}, {transform_indices = @transform_3, window_bounds = array<i64: 2, 4>}]} {
    %c0 = arith.constant 0 : index
    %c0_0 = arith.constant 0 : index
    %c0_1 = arith.constant 0 : index
    %0 = vector.load %arg1[%c0, %c0_0, %c0_1] : memref<2x16x512xf32, #tpu.memory_space<vmem>>, vector<2x16x512xf32>
    %cst = arith.constant dense<0.000000e+00> : vector<2x512xf32>
    %1 = vector.multi_reduction <add>, %0, %cst [1] : vector<2x16x512xf32> to vector<2x512xf32>
    %cst_2 = arith.constant 1.600000e+01 : f32
    %2 = vector.broadcast %cst_2 : f32 to vector<2x512xf32>
    %3 = arith.divf %1, %2 : vector<2x512xf32>
    %c0_3 = arith.constant 0 : index
    %c0_4 = arith.constant 0 : index
    %4 = vector.load %arg2[%c0_3, %c0_4] : memref<4x512xf32, #tpu.memory_space<vmem>>, vector<4x512xf32>
    %cst_5 = arith.constant dense<0.000000e+00> : vector<2x4xf32>
    %5 = tpu.matmul %3, %4, %cst_5 {dimension_numbers = #tpu.dot_dimension_numbers<[1], [1], [0], [0], [0, 0, 1, 0], [], []>} : vector<2x512xf32>, vector<4x512xf32>, vector<2x4xf32> -> vector<2x4xf32>
    %6 = arith.mulf %3, %3 : vector<2x512xf32>
    %cst_6 = arith.constant dense<0.000000e+00> : vector<2xf32>
    %7 = vector.multi_reduction <add>, %6, %cst_6 [1] : vector<2x512xf32> to vector<2xf32>
    %8 = vector.shape_cast %7 : vector<2xf32> to vector<2x1xf32>
    %9 = math.sqrt %8 : vector<2x1xf32>
    %10 = arith.mulf %4, %4 : vector<4x512xf32>
    %cst_7 = arith.constant dense<0.000000e+00> : vector<4xf32>
    %11 = vector.multi_reduction <add>, %10, %cst_7 [1] : vector<4x512xf32> to vector<4xf32>
    %12 = vector.shape_cast %11 : vector<4xf32> to vector<4x1xf32>
    %13 = math.sqrt %12 : vector<4x1xf32>
    %cst_8 = arith.constant 9.99999996E-13 : f32
    %14 = vector.broadcast %cst_8 : f32 to vector<2x1xf32>
    %15 = arith.maximumf %9, %14 : vector<2x1xf32>
    %cst_9 = arith.constant 1.000000e+00 : f32
    %16 = vector.broadcast %cst_9 : f32 to vector<2x1xf32>
    %17 = arith.divf %16, %15 : vector<2x1xf32>
    %cst_10 = arith.constant 9.99999996E-13 : f32
    %18 = vector.broadcast %cst_10 : f32 to vector<4x1xf32>
    %19 = arith.maximumf %13, %18 : vector<4x1xf32>
    %cst_11 = arith.constant 1.000000e+00 : f32
    %20 = vector.broadcast %cst_11 : f32 to vector<4x1xf32>
    %21 = arith.divf %20, %19 : vector<4x1xf32>
    %c0_12 = arith.constant 0 : index
    %22 = memref.load %arg3[%c0_12] : memref<1xf32, #tpu.memory_space<smem>>
    %23 = vector.broadcast %22 : f32 to vector<2x4xf32>
    %24 = arith.mulf %23, %5 : vector<2x4xf32>
    %25 = vector.broadcast %17 : vector<2x1xf32> to vector<2x4xf32>
    %26 = arith.mulf %24, %25 : vector<2x4xf32>
    %27 = tpu.transpose %21, [1, 0] : vector<4x1xf32> -> vector<1x4xf32>
    %28 = vector.broadcast %27 : vector<1x4xf32> to vector<2x4xf32>
    %29 = arith.mulf %26, %28 : vector<2x4xf32>
    %c0_13 = arith.constant 0 : index
    %c0_14 = arith.constant 0 : index
    %30 = vector.load %arg4[%c0_13, %c0_14] : memref<2x4xf32, #tpu.memory_space<vmem>>, vector<2x4xf32>
    tpu.vector_store %arg4[%c0_13, %c0_14], %29 {strides = array<i32>} : memref<2x4xf32, #tpu.memory_space<vmem>>, vector<2x4xf32>,
    return
  }
  func.func @transform_0(%arg0: i32) -> (i32, i32, i32) {
    %c0_i32 = arith.constant 0 : i32
    %c0_i32_0 = arith.constant 0 : i32
    %c0_i32_1 = arith.constant 0 : i32
    return %arg0, %c0_i32, %c0_i32_0 : i32, i32, i32
  }
  func.func @transform_1(%arg0: i32) -> (i32, i32) {
    %c0_i32 = arith.constant 0 : i32
    %c0_i32_0 = arith.constant 0 : i32
    %c0_i32_1 = arith.constant 0 : i32
    return %c0_i32, %c0_i32_0 : i32, i32
  }
  func.func @transform_2(%arg0: i32) -> i32 {
    %c0_i32 = arith.constant 0 : i32
    %c0_i32_0 = arith.constant 0 : i32
    return %c0_i32 : i32
  }
  func.func @transform_3(%arg0: i32) -> (i32, i32) {
    %c0_i32 = arith.constant 0 : i32
    %c0_i32_0 = arith.constant 0 : i32
    return %arg0, %c0_i32 : i32, i32
  }
}

</mosaic_0001>

<bundles_post_ra>
// kernel: tpu_custom_call.1
= control target key start
LH: loop header
LB: loop body
LE: loop exit
PB: predicated region body
PF: predicated region fallthrough
CT: control target
= control target key end

     0   :  { %9 = vsyncpa [#allocation4], 0  ;;  %s588_s0 = inlined_call_operand.hbm [shape: f32[2,16,512], index: 0, kind: input, shape index: {}]   ;;  %s589_s1 = inlined_call_operand.hbm [shape: f32[4,512], index: 1, kind: input, shape index: {}]   ;;  %s590_s2 = inlined_call_operand.<no memory space> [shape: f32[1], index: 2, kind: input, shape index: {}]   ;;  %s591_s3 = inlined_call_operand.hbm [shape: f32[2,4], index: 3, kind: output, shape index: {}]  }
   0x1   :  { %10 = vsyncpa [#allocation7], 0 }
   0x2   :  { %11 = vsyncpa [#allocation5], 0  ;;  %s508_s12 = smov [#allocation3]   ;;  %s436_s16 = scalar_lea.hbm %s588_s0, 2048 }
   0x3   :  { %s17_s13 = sshll.u32 %s508_s12, 4  ;;  %p437_p0 = scmp.ne.s32.totalorder %s588_s0, %s436_s16  ;;  %s18_s13 = int_to_ptr.vmem [resolvable:$true] %s17_s13 }
   0x4   :  { %p440_p1 = scmp.lt.u32.totalorder %s436_s16, %s588_s0 }
   0x6   :  { %p442_p2 = pnand %p440_p1, %p437_p0 }
   0x8   :  { %445 = shalt.err (!%p442_p2)
}
   0x9   :  { %s446_s21 = scalar_lea.vmem %s18_s13, 2048  ;;  %p451_p4 = scmp.lt.s32.totalorder %s18_s13, %s18_s13 }
   0xa   :  { %p447_p3 = scmp.ne.s32.totalorder %s18_s13, %s446_s21  ;;  %p452_p5 = scmp.lt.s32.totalorder %s446_s21, %s446_s21 }
   0xc   :  { %p453_p6 = por %p452_p5, %p451_p4 }
   0xe   :  { %p454_p7 = pnand %p453_p6, %p447_p3 }
  0x10   :  { %457 = shalt.err (!%p454_p7)
}
  0x11   :  { %s509_s22 = smov 512   ;;  %s510_s23 = smov 32  }
  0x12   :  { %23 = dma.hbm_to_vmem [thread:$0]  %s588_s0, 2048, %s18_s13, [#allocation4], %s509_s22, %s509_s22, %s510_s23  }
  0x13   :  { %s511_s26 = smov [#allocation6]   ;;  %s458_s30 = scalar_lea.hbm %s589_s1, 256 }
  0x14   :  { %s30_s27 = sshll.u32 %s511_s26, 4  ;;  %p459_p8 = scmp.ne.s32.totalorder %s589_s1, %s458_s30  ;;  %s31_s27 = int_to_ptr.vmem [resolvable:$true] %s30_s27 }
  0x15   :  { %p462_p9 = scmp.lt.u32.totalorder %s458_s30, %s589_s1 }
  0x17   :  { %p464_p10 = pnand %p462_p9, %p459_p8 }
  0x19   :  { %467 = shalt.err (!%p464_p10)
}
  0x1a   :  { %s468_s8 = scalar_lea.vmem %s31_s27, 256  ;;  %p473_p12 = scmp.lt.s32.totalorder %s31_s27, %s31_s27 }
  0x1b   :  { %p469_p11 = scmp.ne.s32.totalorder %s31_s27, %s468_s8  ;;  %p474_p13 = scmp.lt.s32.totalorder %s468_s8, %s468_s8 }
  0x1d   :  { %p475_p0 = por %p474_p13, %p473_p12 }
  0x1f   :  { %p476_p1 = pnand %p475_p0, %p469_p11 }
  0x21   :  { %479 = shalt.err (!%p476_p1)
}
  0x22   :  { %33 = dma.hbm_to_vmem [thread:$0]  %s589_s1, 256, %s31_s27, [#allocation7]  }
  0x23   :  { %502 = dma.done.wait [#allocation4], 2048  }
  0x24   :  { %503 = vsyncadd [#allocation4], 4294965248 }
  0x25   :  { %504 = dma.done.wait [#allocation7], 256  }
  0x26   :  { %505 = vsyncadd [#allocation7], 4294967040  ;;  %v123_v0 = vld [vmem:[#allocation6] sm:$0xff]  ;;  %v124_v1 = vld [vmem:[#allocation6 + $0x8] sm:$0xff]  ;;  %vm337_vm0 = vcmask 1043456   ;;  %vm133_vm1 = vcmask 1041409  }
  0x27   :  { %v43_v2 = vld [vmem:[#allocation3 + $0x8] sm:$0xff]  ;;  %v329_v3 = vmul.f32 %v123_v0, %v123_v0  ;;  %v330_v4 = vmul.f32 %v124_v1, %v124_v1  ;;  %v144_v5 = vcombine.high %v123_v0, %v123_v0  ;;  %v145_v6 = vcombine.high %v124_v1, %v124_v1  ;;  %v45_v12 = vld [vmem:[#allocation3 + $0x18] sm:$0xff]  ;;  %v42_v20 = vld [vmem:[#allocation3] sm:$0xff]  ;;  %s512_s11 = smov [#allocation8]  }
  0x28   :  { %v47_v7 = vld [vmem:[#allocation3 + $0x28] sm:$0xff]  ;;  %v49_v13 = vld [vmem:[#allocation3 + $0x38] sm:$0xff]  ;;  %v46_v21 = vld [vmem:[#allocation3 + $0x20] sm:$0xff]  ;;  %vm312_vm2 = vcmask 1041408   ;;  %s409_s12 = sshll.u32 %s512_s11, 4  ;;  %vm401_vm7 = vcmask 25600   ;;  %s410_s12 = int_to_ptr.vmem [resolvable:$true] %s409_s12 }
  0x29   :  { %v51_v8 = vld [vmem:[#allocation3 + $0x48] sm:$0xff]  ;;  %v65_v10 = vadd.f32 %v47_v7, %v43_v2  ;;  %v53_v14 = vld [vmem:[#allocation3 + $0x58] sm:$0xff]  ;;  %v333_v15 = vcombine.high %v329_v3, %v329_v3  ;;  %v334_v16 = vcombine.high %v330_v4, %v330_v4  ;;  %v338_v17 = vsel %vm337_vm0, %v329_v3, 0.0  ;;  %148 = vmatprep.subr.mxu1 %v144_v5  ;;  %218 = vmatprep.subr.mxu0 %v145_v6  ;;  %v50_v26 = vld [vmem:[#allocation3 + $0x40] sm:$0xff]  ;;  %s480_s13 = scalar_lea.vmem %s410_s12, 32  ;;  %p485_p3 = scmp.lt.s32.totalorder %s410_s12, %s410_s12 }
  0x2a   :  { %v55_v9 = vld [vmem:[#allocation3 + $0x68] sm:$0xff]  ;;  %v341_v18 = vsel %vm337_vm0, %v330_v4, 0.0  ;;  %v57_v19 = vld [vmem:[#allocation3 + $0x78] sm:$0xff]  ;;  %149 = vmatpush1.xpose.msra.mxu1 %v123_v0  ;;  %219 = vmatpush1.xpose.msra.mxu0 %v124_v1  ;;  %v79_v24 = vadd.f32 %v49_v13, %v45_v12  ;;  %v54_v27 = vld [vmem:[#allocation3 + $0x60] sm:$0xff]  ;;  %v58_v31 = vadd.f32 %v46_v21, %v42_v20  ;;  %p481_p2 = scmp.ne.s32.totalorder %s410_s12, %s480_s13  ;;  %p486_p4 = scmp.lt.s32.totalorder %s480_s13, %s480_s13 }
  0x2b   :  { %v93_v11 = vadd.f32 %v55_v9, %v51_v8  ;;  %v66_v22 = vrot.slane %v65_v10, 4  ;;  %v107_v25 = vadd.f32 %v57_v19, %v53_v14  ;;  %v44_v28 = vld [vmem:[#allocation3 + $0x10] sm:$0xff]  ;;  %v339_v29 = vsel %vm337_vm0, %v333_v15, 0.0 }
  0x2c   :  { %v343_v30 = vsel %vm337_vm0, %v334_v16, 0.0  ;;  %v86_v32 = vadd.f32 %v54_v27, %v50_v26  ;;  %v48_v33 = vld [vmem:[#allocation3 + $0x30] sm:$0xff]  ;;  %v340_v34 = vadd.f32 %v339_v29, %v338_v17  ;;  %v80_v37 = vrot.slane %v79_v24, 4  ;;  %p487_p5 = por %p486_p4, %p485_p3 }
  0x2d   :  { %v94_v23 = vrot.slane %v93_v11, 4  ;;  %v67_v35 = vadd.f32 %v66_v22, %v65_v10  ;;  %v108_v38 = vrot.slane %v107_v25, 4  ;;  %v59_v39 = vrot.slane %v58_v31, 4  ;;  %v52_v49 = vld [vmem:[#allocation3 + $0x50] sm:$0xff] }
  0x2e   :  { %v87_v40 = vrot.slane %v86_v32, 4  ;;  %v72_v41 = vadd.f32 %v48_v33, %v44_v28  ;;  %v342_v42 = vadd.f32 %v341_v18, %v340_v34  ;;  %v81_v45 = vadd.f32 %v80_v37, %v79_v24  ;;  %v56_v50 = vld [vmem:[#allocation3 + $0x70] sm:$0xff]  ;;  %p488_p6 = pnand %p487_p5, %p481_p2 }
  0x2f   :  { %v95_v36 = vadd.f32 %v94_v23, %v93_v11  ;;  %v68_v43 = vrot.slane %v67_v35, 2  ;;  %v109_v46 = vadd.f32 %v108_v38, %v107_v25  ;;  %v60_v47 = vadd.f32 %v59_v39, %v58_v31 }
  0x30   :  { %v88_v48 = vadd.f32 %v87_v40, %v86_v32  ;;  %v73_v51 = vrot.slane %v72_v41, 4  ;;  %v344_v52 = vadd.f32 %v343_v30, %v342_v42  ;;  %v82_v55 = vrot.slane %v81_v45, 2 }
  0x31   :  { %v96_v44 = vrot.slane %v95_v36, 2  ;;  %v69_v53 = vadd.f32 %v68_v43, %v67_v35  ;;  %v110_v56 = vrot.slane %v109_v46, 2  ;;  %v61_v57 = vrot.slane %v60_v47, 2 }
  0x32   :  { %v89_v58 = vrot.slane %v88_v48, 2  ;;  %v74_v59 = vadd.f32 %v73_v51, %v72_v41  ;;  %345 = vadd.xlane.f32.xlu0 %v344_v52  ;;  %v83_v62 = vadd.f32 %v82_v55, %v81_v45  ;;  %v100_v63 = vadd.f32 %v56_v50, %v52_v49 }
  0x33   :  { %v97_v54 = vadd.f32 %v96_v44, %v95_v36  ;;  %v70_v60 = vrot.slane %v69_v53, 1  ;;  %v111_v0 = vadd.f32 %v110_v56, %v109_v46  ;;  %v62_v1 = vadd.f32 %v61_v57, %v60_v47 }
  0x34   :  { %v90_v2 = vadd.f32 %v89_v58, %v88_v48  ;;  %v75_v3 = vrot.slane %v74_v59, 2  ;;  %v84_v6 = vrot.slane %v83_v62, 1  ;;  %v101_v7 = vrot.slane %v100_v63, 4 }
  0x35   :  { %v98_v61 = vrot.slane %v97_v54, 1  ;;  %v71_v4 = vadd.f32 %v70_v60, %v69_v53  ;;  %v112_v8 = vrot.slane %v111_v0, 1  ;;  %v63_v9 = vrot.slane %v62_v1, 1 }
  0x36   :  { %v91_v10 = vrot.slane %v90_v2, 1  ;;  %v76_v11 = vadd.f32 %v75_v3, %v74_v59  ;;  %v85_v14 = vadd.f32 %v84_v6, %v83_v62  ;;  %v102_v15 = vadd.f32 %v101_v7, %v100_v63 }
  0x37   :  { %v99_v5 = vadd.f32 %v98_v61, %v97_v54  ;;  %v116_v12 = vmul.f32 0.0625, %v71_v4  ;;  %v113_v16 = vadd.f32 %v112_v8, %v111_v0  ;;  %v64_v17 = vadd.f32 %v63_v9, %v62_v1 }
  0x38   :  { %v92_v18 = vadd.f32 %v91_v10, %v90_v2  ;;  %v118_v20 = vmul.f32 0.0625, %v85_v14  ;;  %v77_v21 = vrot.slane %v76_v11, 1  ;;  %v103_v27 = vrot.slane %v102_v15, 2 }
  0x39   :  { %v120_v13 = vmul.f32 0.0625, %v99_v5  ;;  %v122_v22 = vmul.f32 0.0625, %v113_v16  ;;  %v115_v23 = vmul.f32 0.0625, %v64_v17  ;;  %v289_v25 = vmul.f32 %v116_v12, %v116_v12 }
  0x3a   :  { %v119_v24 = vmul.f32 0.0625, %v92_v18  ;;  %v78_v32 = vadd.f32 %v77_v21, %v76_v11  ;;  %v104_v33 = vadd.f32 %v103_v27, %v102_v15  ;;  %v291_v37 = vmul.f32 %v118_v20, %v118_v20 }
  0x3b   :  { %v135_v19 = vsel %vm133_vm1, %v120_v13, %v116_v12  ;;  %v293_v26 = vmul.f32 %v120_v13, %v120_v13  ;;  %v137_v28 = vsel %vm133_vm1, %v122_v22, %v118_v20  ;;  %v288_v30 = vmul.f32 %v115_v23, %v115_v23 }
  0x3c   :  { %212 = vmatprep.mubr.f32.mxu1 %v135_v19  ;;  %v134_v29 = vsel %vm133_vm1, %v119_v24, %v115_v23  ;;  %282 = vmatprep.mubr.f32.mxu0 %v137_v28  ;;  %v292_v31 = vmul.f32 %v119_v24, %v119_v24  ;;  %v105_v34 = vrot.slane %v104_v33, 1  ;;  %v295_v38 = vmul.f32 %v122_v22, %v122_v22 }
  0x3d   :  { %213 = vmatmul.mubr.f32.vlgmr.msra.gmra.mrb[0].mxu1 %v134_v29  ;;  %v305_v36 = vsel %vm133_vm1, %v293_v26, %v289_v25  ;;  %v117_v40 = vmul.f32 0.0625, %v78_v32  ;;  %v396_v10 = vlaneseq  ;;  %v361_v12 = vstv %s590_s2 }
  0x3e   :  { %v304_v35 = vsel %vm133_vm1, %v292_v31, %v288_v30  ;;  %v106_v39 = vadd.f32 %v105_v34, %v104_v33  ;;  %v314_v42 = vsel %vm312_vm2, %v305_v36, 0.0  ;;  %v307_v47 = vsel %vm133_vm1, %v295_v38, %v291_v37 }
  0x3f   :  { %v313_v41 = vsel %vm312_vm2, %v304_v35, 0.0  ;;  %v290_v44 = vmul.f32 %v117_v40, %v117_v40  ;;  %v318_v51 = vsel %vm312_vm2, %v307_v47, 0.0  ;;  %v397_v11 = vshrl.u32 %v396_v10, 7 }
  0x40   :  { %v121_v43 = vmul.f32 0.0625, %v106_v39  ;;  %v315_v48 = vadd.f32 %v314_v42, %v313_v41 }
  0x41   :  { %v398_v14 = vsub.s32 0, %v397_v11 }
  0x42   :  { %v136_v45 = vsel %vm133_vm1, %v121_v43, %v117_v40  ;;  %v294_v46 = vmul.f32 %v121_v43, %v121_v43 }
  0x43   :  { %283 = vmatmul.mubr.f32.vlgmr.msra.gmra.mrb[0].mxu0 %v136_v45 }
  0x44   :  { %v306_v49 = vsel %vm133_vm1, %v294_v46, %v290_v44 }
  0x45   :  { %v316_v50 = vsel %vm312_vm2, %v306_v49, 0.0 }
  0x46   :  { %v317_v52 = vadd.f32 %v316_v50, %v315_v48 }
  0x48   :  { %v319_v53 = vadd.f32 %v318_v51, %v317_v52 }
  0x4a   :  { %320 = vadd.xlane.f32.xlu0 %v319_v53 }
  0xbf   :  { %v346_v54 = vpop.xlane.xlu0 %345 }
  0xc0   :  { %428 = vrsqrt.f32 %v346_v54  ;;  %vm349_vm3 = vcmp.eq.f32.partialorder %v346_v54, inf  ;;  %v352_v57 = vand.u32 2147483648, %v346_v54  ;;  %vm351_vm4 = vcmp.eq.f32.partialorder %v346_v54, 0.0 }
  0xca   :  { %v429_v55 = vpop.eup %428 }
  0xcb   :  { %v348_v56 = vmul.f32 %v429_v55, %v346_v54 }
  0xcd   :  { %v350_v58 = vsel %vm349_vm3, %v346_v54, %v348_v56 }
  0xce   :  { %v353_v59 = vsel %vm351_vm4, %v352_v57, %v350_v58 }
  0xcf   :  { %v357_v60 = vmax.f32 %v353_v59, 1e-12 }
  0xd1   :  { %430 = vrcp.f32 %v357_v60 }
  0xd7   :  { %v321_v3 = vpop.xlane.xlu0 %320 }
  0xd8   :  { %432 = vrsqrt.f32 %v321_v3  ;;  %vm324_vm5 = vcmp.eq.f32.partialorder %v321_v3, inf  ;;  %v327_v6 = vand.u32 2147483648, %v321_v3  ;;  %vm326_vm6 = vcmp.eq.f32.partialorder %v321_v3, 0.0 }
  0xdb   :  { %v431_v61 = vpop.eup %430 }
  0xdc   :  { %364 = vxpose.xlu1.b32.start.end [1/1] (short) (narrow) %v431_v61, 8 }
  0xe2   :  { %v433_v4 = vpop.eup %432 }
  0xe3   :  { %v323_v5 = vmul.f32 %v433_v4, %v321_v3 }
  0xe5   :  { %v325_v7 = vsel %vm324_vm5, %v321_v3, %v323_v5 }
  0xe6   :  { %v328_v8 = vsel %vm326_vm6, %v327_v6, %v325_v7 }
  0xe7   :  { %v354_v9 = vmax.f32 %v328_v8, 1e-12 }
  0xe9   :  { %434 = vrcp.f32 %v354_v9 }
  0xf3   :  { %v435_v15 = vpop.eup %434 }
 0x110   :  { %v214_v62 = vpop.f32.mrb[0].mxu1 }
 0x111   :  { %v216_v63 = vpop.f32.mrb[1].mxu1 }
 0x116   :  { %v284_v0 = vpop.f32.mrb[0].mxu0 }
 0x117   :  { %v285_v1 = vadd.f32 %v284_v0, %v214_v62  ;;  %v286_v2 = vpop.f32.mrb[1].mxu0 }
 0x119   :  { %v362_v13 = vmul.f32 %v361_v12, %v285_v1 }
 0x11b   :  { %v363_v17 = vmul.f32 %v435_v15, %v362_v13 }
 0x15c   :  { %v380_v16 = vpop.trf.xlu1 }
 0x15d   :  { %v399_v18 = vrot.slane %v380_v16, %v398_v14 }
 0x15f   :  { %v400_v19 = vmul.f32 %v399_v18, %v363_v17 }
 0x161   :  { %402 = vst.msk [vmem:[#allocation8] sm:$0x3] %vm401_vm7, %v400_v19 }
 0x162   :  { %491 = shalt.err (!%p488_p6)
}
 0x163   :  { %s492_s15 = scalar_lea.hbm %s591_s3, 32 }
 0x164   :  { %p493_p7 = scmp.ne.s32.totalorder %s591_s3, %s492_s15  ;;  %p496_p8 = scmp.lt.u32.totalorder %s492_s15, %s591_s3 }
 0x166   :  { %p498_p9 = pnand %p496_p8, %p493_p7 }
 0x168   :  { %501 = shalt.err (!%p498_p9)
}
 0x169   :  { %412 = dma.vmem_to_hbm [thread:$0]  %s410_s12, 32, %s591_s3, [#allocation5]  }
 0x16a   :  { %506 = dma.done.wait [#allocation5], 32  }
 0x16b   :  { %507 = vsyncadd [#allocation5], 4294967264 }
 0x16c   :  { %416 = vsyncpa [#allocation4], 1 }
 0x16d   :  { %417 = vsyncpa [#allocation7], 1 }
 0x16e   :  { %418 = vsyncpa [#allocation5], 1 }

</bundles_post_ra>
